<compile_context>
chip_gen: v7x
topology: tpu7x:2x2x1
jax: 0.10.0
libtpu: 0.0.40
codegen_flags: <defaults>
</compile_context>

<pallas_src>
import functools

import jax
import jax.numpy as jnp
from jax.experimental import pallas as pl
from jax.experimental.pallas import tpu as pltpu

EPS = 1e-9  # matches nn.BatchNorm1d(num_features, eps=1e-09) in the PyTorch module


def _dice_kernel(x_ref, p_ref, o_ref, *, tf, approx_sigmoid):
    # x_ref: (B, tf) tile.  p_ref: grid-resident (3, F) f32 slab [gamma; beta; alpha].
    j = pl.program_id(0)
    start = pl.multiple_of(j * tf, tf)
    p = p_ref[:, pl.ds(start, tf)]          # (3, tf) window of the resident slab
    gamma = p[0:1, :]
    beta = p[1:2, :]
    alpha = p[2:3, :]

    x = x_ref[...].astype(jnp.float32)

    # Training-mode BatchNorm1d: per-feature mean / biased variance over the batch.
    # Two-pass variance kept deliberately (cancellation-safe vs E[x^2]-mean^2).
    mean = jnp.mean(x, axis=0, keepdims=True)                   # (1, tf)
    centered = x - mean
    var = jnp.mean(centered * centered, axis=0, keepdims=True)  # biased, (1, tf)
    scale = jax.lax.rsqrt(var + EPS) * gamma                    # fold gamma into inv_std
    x_hat = centered * scale + beta

    if approx_sigmoid:
        # exp on EUP + approximate reciprocal on EUP -> no VALU divide.
        x_p = pl.reciprocal(1.0 + jnp.exp(-x_hat), approx=True)
    else:
        x_p = jax.nn.sigmoid(x_hat)

    # Dice gate rewritten: alpha*(1-p)*x + p*x == x * (alpha + p*(1-alpha))
    o_ref[...] = (x * (alpha + x_p * (1.0 - alpha))).astype(o_ref.dtype)


def _tpu_vmem_capacity_bytes():
    try:
        return int(pltpu.get_tpu_info().vmem_capacity_bytes)
    except Exception:
        return 64 << 20  # conservative (v7x-sized) fallback if the query fails


def _choose_tiling(B, F, itemsize):
    """Pick (feature tile tf, buffer count, vmem_limit_bytes) per TPU generation."""
    vmem = _tpu_vmem_capacity_bytes()
    if vmem >= (96 << 20):
        # v5e / v6e class: 128 MiB physical VMEM, single TensorCore per chip.
        budget = 80 << 20
        vmem_limit = 100 << 20
        multi_core = False
    else:
        # v7x class: 64 MiB physical per TC, two TensorCores per chip.
        budget = 24 << 20
        vmem_limit = 40 << 20
        multi_core = True

    params_bytes = 2 * 3 * F * 4  # grid-resident (3, F) f32 slab (double-buffer alloc, 1 DMA)

    def cost(t, nbuf):
        io_bytes = nbuf * 2 * B * t * itemsize   # pipelined input + output tiles
        tmp_bytes = 3 * B * t * 4                # in-kernel f32 temporaries (x, centered, x_p)
        return io_bytes + tmp_bytes + params_bytes

    cands = [t for t in range(128, F + 1, 128) if F % t == 0]
    if not cands:
        # F not a multiple of 128: single full-width tile (full-array block is legal).
        return F, 2, vmem_limit

    def pick(pool):
        multi = [t for t in pool if F // t >= 2]            # keep >= 2 pipeline steps
        if multi_core:
            even = [t for t in multi if (F // t) % 2 == 0]  # balance the two TCs
            if even:
                return max(even)
        if multi:
            return max(multi)
        return max(pool)

    fit2 = [t for t in cands if cost(t, 2) <= budget]
    if fit2:
        return pick(fit2), 2, vmem_limit
    fit1 = [t for t in cands if cost(t, 1) <= budget]
    if fit1:
        return pick(fit1), 1, vmem_limit
    # TODO(synk): very large B — add a batch-tiled two-pass (stats + apply) path;
    # for now single-buffer the smallest legal tile and raise the limit toward physical.
    t0 = cands[0]
    return t0, 1, min(vmem, cost(t0, 1) + (8 << 20))


def dice_forward(x, gamma, beta, alpha, *, approx_sigmoid=True, tf=None):
    """x: (B, F), f32 or bf16. gamma/beta/alpha: (F,). Output dtype == x.dtype."""
    B, F = x.shape
    itemsize = jnp.dtype(x.dtype).itemsize
    auto_tf, nbuf, vmem_limit = _choose_tiling(B, F, itemsize)
    if tf is None:
        tf = auto_tf
    assert F % tf == 0, "feature dim must be a multiple of the feature tile"

    # Pack the three per-feature parameter rows into one (3, F) f32 slab.
    params = jnp.stack([gamma, beta, alpha], axis=0).astype(jnp.float32)

    if nbuf == 2:
        x_spec = pl.BlockSpec((B, tf), lambda j: (0, j))
        o_spec = pl.BlockSpec((B, tf), lambda j: (0, j))
    else:
        x_spec = pl.BlockSpec((B, tf), lambda j: (0, j), pipeline_mode=pl.Buffered(nbuf))
        o_spec = pl.BlockSpec((B, tf), lambda j: (0, j), pipeline_mode=pl.Buffered(nbuf))
    # Grid-resident parameter slab: constant block index => one DMA for the whole grid.
    p_spec = pl.BlockSpec((3, F), lambda j: (0, 0))

    kernel = functools.partial(_dice_kernel, tf=tf, approx_sigmoid=approx_sigmoid)

    return pl.pallas_call(
        kernel,
        out_shape=jax.ShapeDtypeStruct((B, F), x.dtype),
        grid_spec=pltpu.PrefetchScalarGridSpec(
            num_scalar_prefetch=0,
            grid=(F // tf,),
            in_specs=[x_spec, p_spec],
            out_specs=o_spec,
        ),
        compiler_params=pltpu.CompilerParams(
            dimension_semantics=("parallel",),
            vmem_limit_bytes=vmem_limit,
        ),
    )(x, params)


def dice_reference(x, gamma, beta, alpha):
    xf = x.astype(jnp.float32)
    mean = jnp.mean(xf, axis=0, keepdims=True)
    var = jnp.mean((xf - mean) ** 2, axis=0, keepdims=True)
    x_hat = (xf - mean) / jnp.sqrt(var + EPS) * gamma[None, :] + beta[None, :]
    x_p = jax.nn.sigmoid(x_hat)
    return alpha[None, :] * (1.0 - x_p) * xf + x_p * xf


if __name__ == "__main__":
    B, F = 8, 256  # small, TPU-friendly (F multiple of 128)

    key = jax.random.PRNGKey(0)
    x = jax.random.normal(key, (B, F), dtype=jnp.float32)

    # Deterministic parameter init, matching the PyTorch module's __init__:
    # BatchNorm1d affine: weight=1, bias=0; Dice alpha: zeros of shape (F,).
    gamma = jnp.ones((F,), dtype=jnp.float32)
    beta = jnp.zeros((F,), dtype=jnp.float32)
    alpha = jnp.zeros((F,), dtype=jnp.float32)

    ref = dice_reference(x, gamma, beta, alpha)

    # Exact-sigmoid path: validates full semantics at tight tolerance.
    out_exact = jax.block_until_ready(dice_forward(x, gamma, beta, alpha, approx_sigmoid=False))
    assert out_exact.shape == (B, F) and out_exact.dtype == x.dtype
    assert jnp.allclose(out_exact, ref, atol=1e-5, rtol=1e-5), "mismatch vs reference (exact f32)"

    # Fast path: EUP exp + approximate reciprocal for the sigmoid.
    out_fast = jax.block_until_ready(dice_forward(x, gamma, beta, alpha))
    assert jnp.allclose(out_fast, ref, atol=5e-3, rtol=5e-3), "mismatch vs reference (approx f32)"

    # bf16 I/O path (f32 compute inside the kernel): halves HBM traffic.
    x_bf16 = x.astype(jnp.bfloat16)
    out_bf16 = jax.block_until_ready(dice_forward(x_bf16, gamma, beta, alpha))
    ref_bf16 = dice_reference(x_bf16, gamma, beta, alpha)
    assert out_bf16.dtype == jnp.bfloat16
    assert jnp.allclose(out_bf16.astype(jnp.float32), ref_bf16,
                        atol=2e-2, rtol=2e-2), "mismatch vs reference (bf16)"

    print("KERNEL_OK")
</pallas_src>

<mosaic_0001>
module attributes {stable_mosaic.version = 11 : i64} {
  func.func @_dice_kernel(%arg0: i32, %arg1: memref<8x128xf32, #tpu.memory_space<vmem>>, %arg2: memref<3x256xf32, #tpu.memory_space<vmem>>, %arg3: memref<8x128xf32, #tpu.memory_space<vmem>>) attributes {dimension_semantics = [#tpu.dimension_semantics<parallel>], iteration_bounds = array<i64: 2>, scalar_prefetch = 0 : i64, scratch_operands = 0 : i64, tpu.core_type = #tpu.core_type<tc>, window_params = [{transform_indices = @transform_0, window_bounds = array<i64: 8, 128>}, {pipeline_mode = #tpu.pipeline_mode<synchronous>, transform_indices = @transform_1, window_bounds = array<i64: 3, 256>}, {transform_indices = @transform_2, window_bounds = array<i64: 8, 128>}]} {
    %c128_i32 = arith.constant 128 : i32
    %0 = arith.muli %arg0, %c128_i32 : i32
    %1 = tpu.assume_multiple %0, 128 : i32
    %c0 = arith.constant 0 : index
    %2 = arith.index_cast %1 : i32 to index
    %3 = vector.load %arg2[%c0, %2] : memref<3x256xf32, #tpu.memory_space<vmem>>, vector<3x128xf32>
    %4 = vector.extract_strided_slice %3 {offsets = [0, 0], sizes = [1, 128], strides = [1, 1]} : vector<3x128xf32> to vector<1x128xf32>
    %5 = vector.extract_strided_slice %3 {offsets = [1, 0], sizes = [1, 128], strides = [1, 1]} : vector<3x128xf32> to vector<1x128xf32>
    %6 = vector.extract_strided_slice %3 {offsets = [2, 0], sizes = [1, 128], strides = [1, 1]} : vector<3x128xf32> to vector<1x128xf32>
    %c0_0 = arith.constant 0 : index
    %c0_1 = arith.constant 0 : index
    %7 = vector.load %arg1[%c0_0, %c0_1] : memref<8x128xf32, #tpu.memory_space<vmem>>, vector<8x128xf32>
    %cst = arith.constant dense<0.000000e+00> : vector<128xf32>
    %8 = vector.multi_reduction <add>, %7, %cst [0] : vector<8x128xf32> to vector<128xf32>
    %9 = vector.shape_cast %8 : vector<128xf32> to vector<1x128xf32>
    %cst_2 = arith.constant 8.000000e+00 : f32
    %10 = vector.broadcast %cst_2 : f32 to vector<1x128xf32>
    %11 = arith.divf %9, %10 : vector<1x128xf32>
    %12 = vector.broadcast %11 : vector<1x128xf32> to vector<8x128xf32>
    %13 = arith.subf %7, %12 : vector<8x128xf32>
    %14 = arith.mulf %13, %13 : vector<8x128xf32>
    %cst_3 = arith.constant dense<0.000000e+00> : vector<128xf32>
    %15 = vector.multi_reduction <add>, %14, %cst_3 [0] : vector<8x128xf32> to vector<128xf32>
    %16 = vector.shape_cast %15 : vector<128xf32> to vector<1x128xf32>
    %cst_4 = arith.constant 8.000000e+00 : f32
    %17 = vector.broadcast %cst_4 : f32 to vector<1x128xf32>
    %18 = arith.divf %16, %17 : vector<1x128xf32>
    %cst_5 = arith.constant 9.99999971E-10 : f32
    %19 = vector.broadcast %cst_5 : f32 to vector<1x128xf32>
    %20 = arith.addf %18, %19 : vector<1x128xf32>
    %21 = math.rsqrt %20 : vector<1x128xf32>
    %22 = arith.mulf %21, %4 : vector<1x128xf32>
    %23 = vector.broadcast %22 : vector<1x128xf32> to vector<8x128xf32>
    %24 = arith.mulf %13, %23 : vector<8x128xf32>
    %25 = vector.broadcast %5 : vector<1x128xf32> to vector<8x128xf32>
    %26 = arith.addf %24, %25 : vector<8x128xf32>
    %27 = arith.negf %26 : vector<8x128xf32>
    %28 = math.exp %27 : vector<8x128xf32>
    %cst_6 = arith.constant 1.000000e+00 : f32
    %29 = vector.broadcast %cst_6 : f32 to vector<8x128xf32>
    %30 = arith.addf %29, %28 : vector<8x128xf32>
    %31 = arith.divf %29, %30 : vector<8x128xf32>
    %cst_7 = arith.constant 1.000000e+00 : f32
    %32 = vector.broadcast %cst_7 : f32 to vector<1x128xf32>
    %33 = arith.subf %32, %6 : vector<1x128xf32>
    %34 = vector.broadcast %33 : vector<1x128xf32> to vector<8x128xf32>
    %35 = arith.mulf %31, %34 : vector<8x128xf32>
    %36 = vector.broadcast %6 : vector<1x128xf32> to vector<8x128xf32>
    %37 = arith.addf %36, %35 : vector<8x128xf32>
    %38 = arith.mulf %7, %37 : vector<8x128xf32>
    %c0_8 = arith.constant 0 : index
    %c0_9 = arith.constant 0 : index
    %39 = vector.load %arg3[%c0_8, %c0_9] : memref<8x128xf32, #tpu.memory_space<vmem>>, vector<8x128xf32>
    tpu.vector_store %arg3[%c0_8, %c0_9], %38 {strides = array<i32>} : memref<8x128xf32, #tpu.memory_space<vmem>>, vector<8x128xf32>,
    return
  }
  func.func @transform_0(%arg0: i32) -> (i32, i32) {
    %c0_i32 = arith.constant 0 : i32
    %c0_i32_0 = arith.constant 0 : i32
    return %c0_i32, %arg0 : i32, i32
  }
  func.func @transform_1(%arg0: i32) -> (i32, i32) {
    %c0_i32 = arith.constant 0 : i32
    %c0_i32_0 = arith.constant 0 : i32
    %c0_i32_1 = arith.constant 0 : i32
    return %c0_i32, %c0_i32_0 : i32, i32
  }
  func.func @transform_2(%arg0: i32) -> (i32, i32) {
    %c0_i32 = arith.constant 0 : i32
    %c0_i32_0 = arith.constant 0 : i32
    return %c0_i32, %arg0 : i32, i32
  }
}

</mosaic_0001>

<bundles_post_ra>
// kernel: tpu_custom_call.1
= control target key start
LH: loop header
LB: loop body
LE: loop exit
PB: predicated region body
PF: predicated region fallthrough
CT: control target
= control target key end

     0   :  { %7 = vsyncpa [#allocation3], 0  ;;  %s761_s0 = inlined_call_operand.hbm [shape: f32[8,256], index: 0, kind: input, shape index: {}]   ;;  %s762_s1 = inlined_call_operand.hbm [shape: f32[3,256], index: 1, kind: input, shape index: {}]   ;;  %s763_s2 = inlined_call_operand.hbm [shape: f32[8,256], index: 2, kind: output, shape index: {}]  }
   0x1   :  { %9 = vsyncpa [#allocation3 + $0x1], 0 }
   0x2   :  { %10 = vsyncpa [#allocation6], 0 }
   0x3   :  { %11 = vsyncpa [#allocation4], 0 }
   0x4   :  { %13 = vsyncpa [#allocation4 + $0x1], 0  ;;  %s552_s9 = smov 0   ;;  %s554_s10 = smov 0  }
   0x5   :  { %s556_s11 = smov 0   ;;  %s558_s12 = smov 0  }
   0x6 LB: > { %s573_s13 = sadd.s32 4294967295, %s532_s12   ;;  %s324_s14 = sadd.s32 4294967294, %s532_s12   ;;  %s532_s12 = sphi %s558_s12, %s787_s12   ;;  %s528_s11 = sphi %s556_s11, %s786_s11   ;;  %s524_s10 = sphi %s554_s10, %s785_s10   ;;  %s520_s9 = sphi %s552_s9, %s784_s9  }
   0x7   : > { %p39_p0 = scmp.ne.s32.totalorder %s524_s10, %s520_s9  ;;  %p764_p1 = scmp.eq.s32.totalorder %s573_s13, 0 }
   0x8   : > { %p90_p3 = scmp.eq.s32.totalorder %s324_s14, 1  ;;  %p325_p5 = scmp.ge.s32.totalorder %s532_s12, 1 }
   0x9   : > { %p582_p4 = por %p764_p1, %p39_p0  ;;  %p97_p7 = scmp.lt.s32.totalorder %s532_s12, 3 }
   0xa   : > { %p587_p6 = por %p90_p3, %p39_p0  ;;  %s534_s18 = smov [#allocation5]  }
   0xb   : > { %s767_s15 = scalar_select %p582_p4, 1, 0 }
   0xc   : > { %s768_s16 = scalar_select %p587_p6, 1, 0 }
   0xd   : > { %p592_p8 = pnand %p325_p5, %p97_p7  ;;  %s110_s19 = sshll.u32 %s534_s18, 4  ;;  %s111_s19 = int_to_ptr.vmem [resolvable:$true] %s110_s19 }
   0xe   : > { %s600_s20 = sadd.s32 1, %s532_s12   ;;  %s26_s24 = sadd.s32 1, %s528_s11 }
   0xf   : > { %s769_s17 = scalar_select %p592_p8, 1, 0 }
  0x10   : > { %p349_p10 = pneg %p592_p8  ;;  %s23_s22 = ssub.s32 %s532_s12, %s600_s20 }
  0x11   : > { %p610_p12 = scmp.eq.s32.totalorder %s23_s22, 0  ;;  %s404_s27 = scalar_lea.hbm %s762_s1, 128 }
  0x12   : > { %p604_p11 = pnand %p349_p10, %p764_p1  ;;  %p405_p0 = scmp.ne.s32.totalorder %s762_s1, %s404_s27 }
  0x13   : > { %s771_s23 = scalar_select %p610_p12, 1, 0 }
  0x14   : > { %p406_p3 = pneg %p604_p11  ;;  %p411_p10 = scmp.lt.u32.totalorder %s404_s27, %s762_s1 }
  0x16   : > { %p407_p5 = pnand %p406_p3, %p405_p0 }
  0x18   : > { %p408_p7 = pneg %p407_p5 }
  0x1a   : > { %p413_p9 = pnand %p411_p10, %p408_p7 }
  0x1c   : > { %416 = shalt.err (!%p413_p9)
}
  0x1d   : > { %s417_s4 = scalar_lea.vmem %s111_s19, 128  ;;  %p425_p6 = scmp.lt.s32.totalorder %s111_s19, %s111_s19 }
  0x1e   : > { %p418_p1 = scmp.ne.s32.totalorder %s111_s19, %s417_s4  ;;  %p426_p4 = scmp.lt.s32.totalorder %s417_s4, %s417_s4 }
  0x20   : > { %p420_p2 = pnand %p418_p1, %p406_p3  ;;  %p427_p8 = por %p426_p4, %p425_p6 }
  0x22   : > { %p421_p13 = pneg %p420_p2 }
  0x24   : > { %p428_p12 = pnand %p427_p8, %p421_p13 }
  0x26   : > { %431 = shalt.err (!%p428_p12)
}
  0x27   : > { %352 = dma.hbm_to_vmem [thread:$0]  (!%p604_p11), %s762_s1, 128, %s111_s19, [#allocation6]  }
  0x28   : > { %p772_p1 = scmp.ne.s32.totalorder %s771_s23, 0  ;;  %p34_p2 = scmp.eq.s32.totalorder %s532_s12, 0 }
  0x29   : > { %p773_p4 = scmp.ne.s32.totalorder %s528_s11, %s524_s10  ;;  %p774_p6 = scmp.eq.s32.totalorder %s573_s13, 1 }
  0x2a   : > { %s636_s7 = scalar_select %p772_p1, %s528_s11, %s26_s24  }
  0x2b   : > { %p644_p8 = por %p774_p6, %p773_p4  ;;  %p362_p9 = scmp.lt.s32.totalorder %s532_s12, 2 }
  0x2c   : > { %s121_s14 = sand.u32 1, %s528_s11   ;;  %p776_p12 = pmov %p773_p4 }
  0x2d   : > { %s328_s18 = sshll.u32 %s121_s14, 3  ;;  %s329_s21 = sshll.u32 %s532_s12, 7 }
  0x2e   : > { %p35_p13 = por %p34_p2, %p776_p12  ;;  %s657_s19 = scalar_lea.hbm %s761_s0, %s329_s21 }
  0x2f   : > { %s125_s23 = scalar_lea.vmem [#allocation2], %s328_s18  ;;  %s122_s27 = scalar_lea.sflag [#allocation3], %s121_s14 }
  0x30   : > { %s132_s24 = sshll.u32 %s125_s23, 4  ;;  %p659_p11 = pnand %p362_p9, %p35_p13  ;;  %s663_s24 = int_to_ptr.vmem [resolvable:$true] %s132_s24 }
  0x31   : > { %s432_s28 = scalar_lea.hbm %s657_s19, 128  ;;  %s437_s3 = scalar_lea.hbm %s761_s0, 256 }
  0x32   : > { %p433_p0 = scmp.ne.s32.totalorder %s657_s19, %s432_s28  ;;  %p434_p3 = pneg %p659_p11 }
  0x33   : > { %p438_p10 = scmp.lt.u32.totalorder %s657_s19, %s761_s0  ;;  %p439_p1 = scmp.lt.u32.totalorder %s437_s3, %s432_s28 }
  0x34   : > { %p435_p5 = pnand %p434_p3, %p433_p0  ;;  %p441_p4 = scmp.lt.u32.totalorder %s432_s28, %s657_s19 }
  0x35   : > { %p440_p2 = por %p439_p1, %p438_p10 }
  0x36   : > { %p436_p7 = pneg %p435_p5 }
  0x37   : > { %p442_p6 = por %p441_p4, %p440_p2 }
  0x39   : > { %p443_p9 = pnand %p442_p6, %p436_p7 }
  0x3b   : > { %446 = shalt.err (!%p443_p9)
}
  0x3c   : > { %s447_s6 = scalar_lea.vmem %s663_s24, 128  ;;  %s535_s14 = smov [#allocation2]  }
  0x3d   : > { %p448_p12 = scmp.ne.s32.totalorder %s663_s24, %s447_s6  ;;  %s452_s18 = sshll.u32 %s535_s14, 4  ;;  %s453_s18 = int_to_ptr.vmem [resolvable:$false] %s452_s18 }
  0x3e   : > { %s454_s21 = scalar_lea.vmem %s453_s18, 256  ;;  %p455_p5 = scmp.lt.s32.totalorder %s663_s24, %s453_s18 }
  0x3f   : > { %p450_p13 = pnand %p448_p12, %p434_p3  ;;  %p456_p10 = scmp.lt.s32.totalorder %s454_s21, %s447_s6 }
  0x41   : > { %p451_p0 = pneg %p450_p13  ;;  %p457_p1 = por %p456_p10, %p455_p5 }
  0x43   : > { %p458_p2 = pnand %p457_p1, %p451_p0 }
  0x45   : > { %461 = shalt.err (!%p458_p2)
}
  0x46   : > { %356 = dma.hbm_to_vmem [thread:$0]  (!%p659_p11), %s657_s19, 128, %s663_s24, %s122_s27  }
  0x47   : > { %p778_p7 = scmp.ne.s32.totalorder %s769_s17, 0 }
  0x48   : > { %s693_s22 = sand.u32 (!%p778_p7), 1, %s524_s10   ;;  %p779_p3 = scmp.ne.s32.totalorder (!%p778_p7), %s767_s15, 0 }
  0x49   : > { %141 = sbr.rel (%p778_p7) target bundleno = 184 (0xb8), region = 28  ;;  %s331_s25 = sshll.u32 (!%p778_p7), %s693_s22, 3 }
  0x4a   : > { %s144_s23 = scalar_lea.sflag (!%p778_p7), [#allocation3], %s693_s22  ;;  %s147_s28 = scalar_lea.vmem (!%p778_p7), [#allocation2], %s331_s25 }
  0x50   : > { %507 = dma.done.wait (%p779_p3), %s144_s23, 128  }
  0x51   : > { %509 = vsyncadd (%p779_p3), %s144_s23, 4294967168  ;;  %p780_p11 = scmp.eq.s32.totalorder %s573_s13, 0 }
  0x53   : > { %511 = dma.done.wait (%p780_p11), [#allocation6], 128   ;;  %p781_p4 = pmov %p780_p11 }
  0x54   : > { %v178_v0 = vld [vmem:[%s147_s28] sm:$0xff]  ;;  %s334_s15 = sshll.u32 %s573_s13, 7  ;;  %v199_v18 = vlaneseq  ;;  %s171_s26 = scalar_lea.vmem [#allocation7], %s331_s25 }
  0x55   : > { %513 = vsyncadd (%p781_p4), [#allocation6], 4294967168  ;;  %v179_v1 = vrot.slane %v178_v0, 4  ;;  %s173_s17 = sshra.s32 %s334_s15, 7  ;;  %s242_s27 = sshll.u32 %s171_s26, 4  ;;  %s712_s27 = int_to_ptr.vmem [resolvable:$true] %s242_s27 }
  0x56   : > { %s335_s19 = sshll.u32 %s173_s17, 2  ;;  %v200_v19 = vshrl.u32 %v199_v18, 7  ;;  %s719_s3 = scalar_lea.hbm %s763_s2, %s334_s15 }
  0x57   : > { %v180_v2 = vadd.f32 %v179_v1, %v178_v0  ;;  %s176_s24 = scalar_lea.vmem [#allocation5], %s335_s19  ;;  %s229_s4 = scalar_lea.sflag [#allocation4], %s693_s22 }
  0x58   : > { %v177_v20 = vld [vmem:[%s176_s24] sm:$0x7]  ;;  %v201_v21 = vsub.s32 0, %v200_v19  ;;  %v206_v22 = vsub.s32 1, %v200_v19  ;;  %v218_v33 = vsub.s32 2, %v200_v19  ;;  %s462_s5 = scalar_lea.vmem %s712_s27, 128 }
  0x59   : > { %v181_v3 = vrot.slane %v180_v2, 2  ;;  %v215_v32 = vsub.f32 1.0, %v177_v20  ;;  %p463_p6 = scmp.ne.s32.totalorder %s712_s27, %s462_s5  ;;  %s536_s6 = smov [#allocation7]  }
  0x5a   : > { %v207_v26 = vrot.slane %v177_v20, %v206_v22  ;;  %v224_v35 = vrot.slane %v177_v20, %v218_v33  ;;  %s466_s14 = sshll.u32 %s536_s6, 4  ;;  %s467_s14 = int_to_ptr.vmem [resolvable:$false] %s466_s14 }
  0x5b   : > { %v182_v4 = vadd.f32 %v181_v3, %v180_v2  ;;  %v219_v34 = vrot.slane %v215_v32, %v218_v33  ;;  %p464_p9 = pnand %p463_p6, %p644_p8  ;;  %s468_s18 = scalar_lea.vmem %s467_s14, 256 }
  0x5c   : > { %p469_p13 = scmp.lt.s32.totalorder %s712_s27, %s467_s14  ;;  %p470_p0 = scmp.lt.s32.totalorder %s468_s18, %s462_s5 }
  0x5d   : > { %v183_v5 = vrot.slane %v182_v4, 1  ;;  %p465_p12 = pneg %p464_p9 }
  0x5e   : > { %p471_p5 = por %p470_p0, %p469_p13 }
  0x5f   : > { %v184_v6 = vadd.f32 %v183_v5, %v182_v4 }
  0x60   : > { %p472_p10 = pnand %p471_p5, %p465_p12 }
  0x61   : > { %v186_v7 = vmul.f32 0.125, %v184_v6 }
  0x63   : > { %v187_v8 = vsub.f32 %v178_v0, %v186_v7 }
  0x65   : > { %v188_v9 = vmul.f32 %v187_v8, %v187_v8 }
  0x67   : > { %v189_v10 = vrot.slane %v188_v9, 4 }
  0x69   : > { %v190_v11 = vadd.f32 %v189_v10, %v188_v9 }
  0x6b   : > { %v191_v12 = vrot.slane %v190_v11, 2 }
  0x6d   : > { %v192_v13 = vadd.f32 %v191_v12, %v190_v11 }
  0x6f   : > { %v193_v14 = vrot.slane %v192_v13, 1 }
  0x71   : > { %v194_v15 = vadd.f32 %v193_v14, %v192_v13 }
  0x73   : > { %v195_v16 = vmul.f32 0.125, %v194_v15 }
  0x75   : > { %v196_v17 = vadd.f32 1e-09, %v195_v16 }
  0x77   : > { %398 = vrsqrt.f32 %v196_v17 }
  0x81   : > { %v399_v23 = vpop.eup %398 }
  0x82   : > { %v198_v24 = vmul.f32 %v399_v23, %v177_v20 }
  0x84   : > { %v202_v25 = vrot.slane %v198_v24, %v201_v21 }
  0x86   : > { %v203_v27 = vmul.f32 %v202_v25, %v187_v8 }
  0x88   : > { %v208_v28 = vadd.f32 %v207_v26, %v203_v27 }
  0x8a   : > { %v336_v29 = vmul.f32 -1.442695, %v208_v28 }
  0x8c   : > { %400 = vpow2.f32 %v336_v29 }
  0x96   : > { %v401_v30 = vpop.eup %400 }
  0x97   : > { %v212_v31 = vadd.f32 1.0, %v401_v30 }
  0x99   : > { %402 = vrcp.f32 %v212_v31 }
  0xa3   : > { %v403_v36 = vpop.eup %402 }
  0xa4   : > { %v220_v37 = vmul.f32 %v403_v36, %v219_v34 }
  0xa6   : > { %v225_v38 = vadd.f32 %v224_v35, %v220_v37 }
  0xa8   : > { %v226_v39 = vmul.f32 %v225_v38, %v178_v0 }
  0xaa   : > { %227 = vst [vmem:[%s171_s26] sm:$0xff] %v226_v39 }
  0xab   : > { %475 = shalt.err (!%p472_p10)
}
  0xac   : > { %s476_s13 = scalar_lea.hbm %s719_s3, 128  ;;  %s480_s25 = scalar_lea.hbm %s763_s2, 256 }
  0xad   : > { %p477_p1 = scmp.ne.s32.totalorder %s719_s3, %s476_s13  ;;  %p481_p3 = scmp.lt.u32.totalorder %s719_s3, %s763_s2 }
  0xae   : > { %p482_p11 = scmp.lt.u32.totalorder %s480_s25, %s476_s13  ;;  %p484_p6 = scmp.lt.u32.totalorder %s476_s13, %s719_s3 }
  0xaf   : > { %p478_p2 = pnand %p477_p1, %p644_p8 }
  0xb0   : > { %p483_p4 = por %p482_p11, %p481_p3 }
  0xb1   : > { %p479_p7 = pneg %p478_p2 }
  0xb2   : > { %p485_p9 = por %p484_p6, %p483_p4 }
  0xb4   : > { %p486_p12 = pnand %p485_p9, %p479_p7 }
  0xb6   : > { %489 = shalt.err (!%p486_p12)
}
  0xb7   : > { %347 = dma.vmem_to_hbm [thread:$0]  (%p644_p8), %s712_s27, 128, %s719_s3, %s229_s4  }
  0xb8 PF: > { %s254_s15 = sand.u32 1, %s520_s9   ;;  %p782_p13 = scmp.ne.s32.totalorder %s768_s16, 0 }
  0xb9   : > { %p783_p0 = scmp.ge.s32.totalorder %s532_s12, 2  ;;  %s255_s17 = scalar_lea.sflag [#allocation4], %s254_s15 }
  0xbb   : > { %p358_p5 = pnand %p783_p0, %p782_p13 }
  0xbd   : > { %515 = dma.done.wait (!%p358_p5), %s255_s17, 128  }
  0xbe   : > { %517 = vsyncadd (!%p358_p5), %s255_s17, 4294967168  ;;  %p16_p10 = scmp.ge.s32.totalorder %s600_s20, 4   ;;  %s784_s9 = smov %s524_s10 }
  0xbf   : > { %s785_s10 = smov %s528_s11  ;;  %s786_s11 = smov %s636_s7 }
  0xc0   : > { %s787_s12 = smov %s600_s20  ;;  %18 = sbr.rel (!%p16_p10) target bundleno = 6 (0x6), region = 78 }
  0xc7   :  { %260 = vsyncpa [#allocation3], 1 }
  0xc8   :  { %262 = vsyncpa [#allocation3 + $0x1], 1 }
  0xc9   :  { %263 = vsyncpa [#allocation6], 1 }
  0xca   :  { %264 = vsyncpa [#allocation4], 1 }
  0xcb   :  { %266 = vsyncpa [#allocation4 + $0x1], 1 }

</bundles_post_ra>
